<compile_context>
chip_gen: v7x
topology: tpu7x:2x2x1
jax: 0.10.0
libtpu: 0.0.40
codegen_flags: <defaults>
</compile_context>

<pallas_src>
import jax
import jax.numpy as jnp
from jax.experimental import pallas as pl
from jax.experimental.pallas import tpu as pltpu


# ---------------------------------------------------------------------------
# Faithful translation of BaseAggregator.forward (an empty stub).
# ---------------------------------------------------------------------------
def base_aggregator_forward():
    # TODO(synk): BaseAggregator.forward() is an empty stub in the reference
    # module (no inputs, no parameters, returns None); there is no compute to
    # port.  Returning None mirrors the PyTorch semantics exactly.
    return None


# ---------------------------------------------------------------------------
# Pallas pass-through scaffolding (what a concrete aggregator would fuse into)
# ---------------------------------------------------------------------------
def _passthrough_kernel(x_ref, o_ref):
    o_ref[...] = x_ref[...]


_SMALL_INPUT_BYTES = 2 << 20   # below this, one full-array block wins
_TARGET_TILE_BYTES = 4 << 20   # ~2-8 MiB per-step DMA hides grid-step overhead
_MAX_LANE_WIDTH = 32768        # widest lane-dense slab we reshape to


def _sublane_granularity(dtype) -> int:
    """Row-tile granularity: 8 for f32, 16 for bf16, 32 for int8/fp8."""
    itemsize = max(jnp.dtype(dtype).itemsize, 1)
    return max(8, 32 // itemsize)


def _vmem_cap_bytes() -> int:
    """Per-TensorCore VMEM budget with headroom for compiler-internal scratch."""
    try:
        physical = int(pltpu.get_tpu_info().vmem_capacity_bytes)
    except Exception:
        physical = 64 << 20  # conservative (v7x-sized) fallback
    # ~52 MiB on a 64 MiB part (v7x), ~105 MiB on 128 MiB parts (v5e/v6e).
    cap = min(int(physical * 0.82), physical - (12 << 20))
    return max(cap, 32 << 20)


def _round_down(v: int, g: int) -> int:
    return (v // g) * g


def lane_dense_2d(x: jax.Array) -> jax.Array:
    """Flatten to (rows, feats) with the widest feats = 128*k dividing x.size."""
    e = int(x.size)
    assert e % 128 == 0, "element count must be a multiple of 128"
    base = e // 128
    k = 1
    for cand in range(min(base, _MAX_LANE_WIDTH // 128), 0, -1):
        if base % cand == 0:
            k = cand
            break
    return x.reshape(-1, 128 * k)


def passthrough(x: jax.Array, *, force_kernel: bool = False) -> jax.Array:
    """Identity over a lane-dense 2-D (rows, 128*k) slab.

    With nothing fused, the identity short-circuits (no HBM traffic).  With
    force_kernel=True the array is streamed through a byte-budget-tiled
    Pallas copy kernel — the scaffolding a concrete aggregator subclass would
    hang its compute on.
    """
    if not force_kernel:
        # No fused compute -> copying every byte HBM->VMEM->HBM is pure
        # bandwidth waste; return the input unchanged.
        return x

    assert x.ndim == 2
    rows, feats = x.shape
    assert feats % 128 == 0, "last dim must be lane-dense (multiple of 128)"

    itemsize = jnp.dtype(x.dtype).itemsize
    row_bytes = feats * itemsize
    total_bytes = rows * row_bytes
    gran = _sublane_granularity(x.dtype)
    cap = _vmem_cap_bytes()

    if total_bytes <= _SMALL_INPUT_BYTES or rows < 2 * gran:
        # Tiny input: one full-array block; per-step pipeline overhead
        # (~0.35 us) would dominate any tiling.
        tr = rows
        grid = (1,)
    else:
        # Byte-budget tiling: ~TARGET bytes per step, bounded so the 2-deep
        # double-buffered (in + out) tiles fit under the VMEM cap, and capped
        # at rows//2 so grid >= 2 (both v7x TensorCores get work).
        budget_rows = (cap - (2 << 20)) // (4 * row_bytes)
        tr = min(_TARGET_TILE_BYTES // row_bytes, budget_rows, rows // 2)
        tr = max(_round_down(tr, gran), gran)
        grid = (pl.cdiv(rows, tr),)  # partial last block handled by Pallas

    tile_bytes = tr * row_bytes
    # 2 operands (in + out) x 2-deep double buffering + headroom, under cap.
    vmem_limit = int(min(max(4 * tile_bytes + (2 << 20), 8 << 20), cap))

    return pl.pallas_call(
        _passthrough_kernel,
        out_shape=jax.ShapeDtypeStruct((rows, feats), x.dtype),
        grid=grid,
        in_specs=[pl.BlockSpec((tr, feats), lambda i: (i, 0))],
        out_specs=pl.BlockSpec((tr, feats), lambda i: (i, 0)),
        compiler_params=pltpu.CompilerParams(
            dimension_semantics=("parallel",),
            vmem_limit_bytes=vmem_limit,
        ),
    )(x)


if __name__ == "__main__":
    # Deterministic example input (NCHW), consistent with an image-MIL setting.
    key = jax.random.PRNGKey(0)
    x_nchw = jax.random.normal(key, (2, 4, 16, 16), dtype=jnp.float32)

    # 1) Faithful BaseAggregator forward: no inputs, no params, returns None.
    assert base_aggregator_forward() is None

    # 2) Default path: identity short-circuits (no HBM traffic at all).
    x2d = lane_dense_2d(x_nchw)             # 2048 elems -> (1, 2048) slab
    assert passthrough(x2d) is x2d

    # 3) Kernel path (what a subclass would fuse compute into): run it once.
    #    Tiny input -> single full-array block, no wasted grid steps.
    y2d = passthrough(x2d, force_kernel=True)
    y = jax.block_until_ready(y2d).reshape(x_nchw.shape)
    assert y.shape == x_nchw.shape
    assert jnp.allclose(y, x_nchw)

    print("KERNEL_OK")
</pallas_src>

<mosaic_0001>
module attributes {stable_mosaic.version = 11 : i64} {
  func.func @_passthrough_kernel(%arg0: i32, %arg1: memref<1x2048xf32, #tpu.memory_space<vmem>>, %arg2: memref<1x2048xf32, #tpu.memory_space<vmem>>) attributes {dimension_semantics = [#tpu.dimension_semantics<parallel>], iteration_bounds = array<i64: 1>, scalar_prefetch = 0 : i64, scratch_operands = 0 : i64, tpu.core_type = #tpu.core_type<tc>, window_params = [{transform_indices = @transform_0, window_bounds = array<i64: 1, 2048>}, {transform_indices = @transform_1, window_bounds = array<i64: 1, 2048>}]} {
    %c0 = arith.constant 0 : index
    %c0_0 = arith.constant 0 : index
    %0 = vector.load %arg1[%c0, %c0_0] : memref<1x2048xf32, #tpu.memory_space<vmem>>, vector<1x2048xf32>
    %c0_1 = arith.constant 0 : index
    %c0_2 = arith.constant 0 : index
    %1 = vector.load %arg2[%c0_1, %c0_2] : memref<1x2048xf32, #tpu.memory_space<vmem>>, vector<1x2048xf32>
    tpu.vector_store %arg2[%c0_1, %c0_2], %0 {strides = array<i32>} : memref<1x2048xf32, #tpu.memory_space<vmem>>, vector<1x2048xf32>,
    return
  }
  func.func @transform_0(%arg0: i32) -> (i32, i32) {
    %c0_i32 = arith.constant 0 : i32
    %c0_i32_0 = arith.constant 0 : i32
    return %arg0, %c0_i32 : i32, i32
  }
  func.func @transform_1(%arg0: i32) -> (i32, i32) {
    %c0_i32 = arith.constant 0 : i32
    %c0_i32_0 = arith.constant 0 : i32
    return %arg0, %c0_i32 : i32, i32
  }
}

</mosaic_0001>

<bundles_post_ra>
// kernel: tpu_custom_call.1
= control target key start
LH: loop header
LB: loop body
LE: loop exit
PB: predicated region body
PF: predicated region fallthrough
CT: control target
= control target key end

     0   :  { %6 = vsyncpa [#allocation3], 0  ;;  %s126_s0 = inlined_call_operand.hbm [shape: f32[1,2048], index: 0, kind: input, shape index: {}]   ;;  %s127_s1 = inlined_call_operand.hbm [shape: f32[1,2048], index: 1, kind: output, shape index: {}]  }
   0x1   :  { %7 = vsyncpa [#allocation4], 0  ;;  %s90_s6 = smov [#allocation2]   ;;  %s42_s10 = scalar_lea.hbm %s126_s0, 256 }
   0x2   :  { %s14_s7 = sshll.u32 %s90_s6, 4  ;;  %p43_p0 = scmp.ne.s32.totalorder %s126_s0, %s42_s10  ;;  %s15_s7 = int_to_ptr.vmem [resolvable:$true] %s14_s7 }
   0x3   :  { %p46_p1 = scmp.lt.u32.totalorder %s42_s10, %s126_s0 }
   0x5   :  { %p48_p2 = pnand %p46_p1, %p43_p0 }
   0x7   :  { %51 = shalt.err (!%p48_p2)
}
   0x8   :  { %s52_s15 = scalar_lea.vmem %s15_s7, 256  ;;  %p57_p4 = scmp.lt.s32.totalorder %s15_s7, %s15_s7 }
   0x9   :  { %p53_p3 = scmp.ne.s32.totalorder %s15_s7, %s52_s15  ;;  %p58_p5 = scmp.lt.s32.totalorder %s52_s15, %s52_s15 }
   0xb   :  { %p59_p6 = por %p58_p5, %p57_p4 }
   0xd   :  { %p60_p7 = pnand %p59_p6, %p53_p3 }
   0xf   :  { %63 = shalt.err (!%p60_p7)
}
  0x10   :  { %17 = dma.hbm_to_vmem [thread:$0]  %s126_s0, 256, %s15_s7, [#allocation3]  }
  0x11   :  { %86 = dma.done.wait [#allocation3], 256  }
  0x12   :  { %87 = vsyncadd [#allocation3], 4294967040  ;;  %s91_s18 = smov [#allocation5]   ;;  %v21_v0 = vld [vmem:[#allocation2] sm:$0xff]  ;;  %v22_v1 = vld [vmem:[#allocation2 + $0x8] sm:$0xff] }
  0x13   :  { %s31_s19 = sshll.u32 %s91_s18, 4  ;;  %23 = vst [vmem:[#allocation5] sm:$0xff] %v21_v0  ;;  %24 = vst [vmem:[#allocation5 + $0x8] sm:$0xff] %v22_v1  ;;  %s32_s19 = int_to_ptr.vmem [resolvable:$true] %s31_s19 }
  0x14   :  { %s64_s20 = scalar_lea.vmem %s32_s19, 256  ;;  %p69_p9 = scmp.lt.s32.totalorder %s32_s19, %s32_s19 }
  0x15   :  { %p65_p8 = scmp.ne.s32.totalorder %s32_s19, %s64_s20  ;;  %p70_p10 = scmp.lt.s32.totalorder %s64_s20, %s64_s20 }
  0x17   :  { %p71_p11 = por %p70_p10, %p69_p9 }
  0x19   :  { %p72_p12 = pnand %p71_p11, %p65_p8 }
  0x1b   :  { %75 = shalt.err (!%p72_p12)
}
  0x1c   :  { %s76_s0 = scalar_lea.hbm %s127_s1, 256 }
  0x1d   :  { %p77_p13 = scmp.ne.s32.totalorder %s127_s1, %s76_s0  ;;  %p80_p0 = scmp.lt.u32.totalorder %s76_s0, %s127_s1 }
  0x1f   :  { %p82_p1 = pnand %p80_p0, %p77_p13 }
  0x21   :  { %85 = shalt.err (!%p82_p1)
}
  0x22   :  { %34 = dma.vmem_to_hbm [thread:$0]  %s32_s19, 256, %s127_s1, [#allocation4]  }
  0x23   :  { %88 = dma.done.wait [#allocation4], 256  }
  0x24   :  { %89 = vsyncadd [#allocation4], 4294967040 }
  0x25   :  { %38 = vsyncpa [#allocation3], 1 }
  0x26   :  { %39 = vsyncpa [#allocation4], 1 }

</bundles_post_ra>
